<compile_context>
chip_gen: v5e
topology: v5e:2x2
jax: 0.10.0
libtpu: 0.0.40
codegen_flags: <defaults>
</compile_context>

<pallas_src>
import math

import jax
import jax.numpy as jnp
from jax.experimental import pallas as pl
from jax.experimental.pallas import tpu as pltpu


def _make_kernel(C, Cmid, use_mxu1, use_mxu2):
    """Kernel over one (C, tn) tile of spatial locations of one batch element."""

    def kernel(x_ref, w1t_ref, b1_ref, w2t_ref, b2_ref, o_ref):
        # x_ref:   (C, tn)     tile of spatial locations (channels-first)
        # w1t_ref: (Cmid, C)   first 1x1 conv, transposed for (Cmid,C)x(C,tn)
        # b1_ref:  (Cmid, 1)
        # w2t_ref: (1, Cmid)   second 1x1 conv, transposed
        # b2_ref:  (1,)        scalar bias in SMEM
        # o_ref:   (1, tn)     lane-dense output tile
        x = x_ref[...]                                    # (C, tn) f32
        w1t = w1t_ref[...]                                # (Cmid, C)

        if use_mxu1:
            h = jnp.dot(w1t, x, preferred_element_type=jnp.float32)
        else:
            # VPU broadcast-FMA: sum_c w1t[:, c] (outer) x[c, :]
            h = w1t[:, 0:1] * x[0:1, :]
            for c in range(1, C):
                h = h + w1t[:, c:c + 1] * x[c:c + 1, :]

        h = jnp.maximum(h + b1_ref[...], 0.0)             # (Cmid, tn), ReLU

        w2t = w2t_ref[...]                                # (1, Cmid)
        if use_mxu2:
            y = jnp.dot(w2t, h, preferred_element_type=jnp.float32)
        else:
            y = w2t[:, 0:1] * h[0:1, :]
            for m in range(1, Cmid):
                y = y + w2t[:, m:m + 1] * h[m:m + 1, :]

        y = y + b2_ref[0]                                 # scalar bias from SMEM
        o_ref[...] = jax.nn.sigmoid(y).astype(o_ref.dtype)

    return kernel


def _pick_spatial_tile(hw, max_tn=4096):
    """Largest multiple of 128 that divides hw (capped at max_tn); else full hw."""
    if hw % 128 == 0:
        best = 128
        cand = 128
        while cand <= min(hw, max_tn):
            if hw % cand == 0:
                best = cand
            cand += 128
        return best
    # TODO(synk): for very large HW that is not a multiple of 128, add masked
    # tail handling instead of a single full-width tile.
    return hw


def spatial_weight_forward(x, w1, b1, w2, b2, *, max_tn=4096):
    """x: (B, C, H, W) float32.  w1: (C, Cmid), b1: (Cmid,), w2: (Cmid, 1), b2: (1,).

    Returns (B, 1, H, W) = sigmoid(conv1x1_2(relu(conv1x1_1(x)))).
    """
    B, C, H, W = x.shape
    Cmid = w1.shape[1]
    HW = H * W

    # Native layout views -- no data movement for contiguous NCHW input.
    x3 = x.reshape(B, C, HW)          # (B, C, HW)
    w1t = w1.T                        # (Cmid, C)
    b1c = b1.reshape(Cmid, 1)         # (Cmid, 1)
    w2t = w2.T                        # (1, Cmid)
    b2s = b2.reshape(1)               # (1,) scalar -> SMEM

    tn = _pick_spatial_tile(HW, max_tn)
    grid = (B, HW // tn)

    kernel = _make_kernel(C, Cmid, use_mxu1=C > 8, use_mxu2=Cmid > 8)

    out3 = pl.pallas_call(
        kernel,
        out_shape=jax.ShapeDtypeStruct((B, 1, HW), x.dtype),
        grid_spec=pltpu.PrefetchScalarGridSpec(
            num_scalar_prefetch=0,
            grid=grid,
            in_specs=[
                # x: one batch element (squeezed), all channels, tn spatial cols
                pl.BlockSpec((pl.Squeezed(), C, tn), lambda b, j: (b, 0, j)),
                # weights / biases: resident (constant index_map -> no re-DMA)
                pl.BlockSpec((Cmid, C), lambda b, j: (0, 0)),
                pl.BlockSpec((Cmid, 1), lambda b, j: (0, 0)),
                pl.BlockSpec((1, Cmid), lambda b, j: (0, 0)),
                # scalar output bias in SMEM
                pl.BlockSpec(memory_space=pltpu.MemorySpace.SMEM),
            ],
            out_specs=pl.BlockSpec((pl.Squeezed(), 1, tn), lambda b, j: (b, 0, j)),
        ),
        compiler_params=pltpu.CompilerParams(
            dimension_semantics=("parallel", "parallel"),
        ),
    )(x3, w1t, b1c, w2t, b2s)

    return out3.reshape(B, 1, H, W)


def init_params(key, dim, reduction=1):
    """Deterministic init mimicking PyTorch Conv2d defaults (kaiming-uniform)."""
    cmid = dim // reduction
    k1, k2, k3, k4 = jax.random.split(key, 4)
    bound1 = 1.0 / math.sqrt(dim)       # fan_in = dim * 1 * 1
    bound2 = 1.0 / math.sqrt(cmid)      # fan_in = cmid * 1 * 1
    w1 = jax.random.uniform(k1, (dim, cmid), jnp.float32, -bound1, bound1)
    b1 = jax.random.uniform(k2, (cmid,), jnp.float32, -bound1, bound1)
    w2 = jax.random.uniform(k3, (cmid, 1), jnp.float32, -bound2, bound2)
    b2 = jax.random.uniform(k4, (1,), jnp.float32, -bound2, bound2)
    return w1, b1, w2, b2


def reference_forward(x, w1, b1, w2, b2):
    """Pure-JAX reference with identical semantics."""
    B, C, H, W = x.shape
    xf = jnp.transpose(x, (0, 2, 3, 1)).reshape(B * H * W, C)
    h = jnp.maximum(xf @ w1 + b1, 0.0)
    y = jax.nn.sigmoid(h @ w2 + b2)
    return jnp.transpose(y.reshape(B, H, W, 1), (0, 3, 1, 2))


if __name__ == "__main__":
    key = jax.random.PRNGKey(0)
    kx, kp = jax.random.split(key)

    B, C, H, W = 2, 4, 16, 16
    reduction = 1
    x = jax.random.normal(kx, (B, C, H, W), jnp.float32)
    w1, b1, w2, b2 = init_params(kp, C, reduction)

    out = spatial_weight_forward(x, w1, b1, w2, b2)
    out = jax.block_until_ready(out)

    ref = reference_forward(x, w1, b1, w2, b2)
    assert out.shape == (B, 1, H, W), out.shape
    assert jnp.allclose(out, ref, atol=1e-5, rtol=1e-5), "mismatch vs reference"

    print("KERNEL_OK")
</pallas_src>

<mosaic_0001>
module attributes {stable_mosaic.version = 11 : i64} {
  func.func @kernel(%arg0: i32, %arg1: i32, %arg2: memref<1x4x256xf32, #tpu.memory_space<vmem>>, %arg3: memref<4x4xf32, #tpu.memory_space<vmem>>, %arg4: memref<4x1xf32, #tpu.memory_space<vmem>>, %arg5: memref<1x4xf32, #tpu.memory_space<vmem>>, %arg6: memref<1xf32, #tpu.memory_space<smem>>, %arg7: memref<1x1x256xf32, #tpu.memory_space<vmem>>) attributes {dimension_semantics = [#tpu.dimension_semantics<parallel>, #tpu.dimension_semantics<parallel>], iteration_bounds = array<i64: 2, 1>, scalar_prefetch = 0 : i64, scratch_operands = 0 : i64, tpu.core_type = #tpu.core_type<tc>, window_params = [{transform_indices = @transform_0, window_bounds = array<i64: 1, 4, 256>}, {pipeline_mode = #tpu.pipeline_mode<synchronous>, transform_indices = @transform_1, window_bounds = array<i64: 4, 4>}, {pipeline_mode = #tpu.pipeline_mode<synchronous>, transform_indices = @transform_2, window_bounds = array<i64: 4, 1>}, {pipeline_mode = #tpu.pipeline_mode<synchronous>, transform_indices = @transform_3, window_bounds = array<i64: 1, 4>}, {transform_indices = @transform_4, window_bounds = array<i64: 1>}, {transform_indices = @transform_5, window_bounds = array<i64: 1, 1, 256>}]} {
    %c0 = arith.constant 0 : index
    %c0_0 = arith.constant 0 : index
    %c0_1 = arith.constant 0 : index
    %0 = vector.load %arg2[%c0, %c0_0, %c0_1] : memref<1x4x256xf32, #tpu.memory_space<vmem>>, vector<1x4x256xf32>
    %1 = vector.shape_cast %0 : vector<1x4x256xf32> to vector<4x256xf32>
    %c0_2 = arith.constant 0 : index
    %c0_3 = arith.constant 0 : index
    %2 = vector.load %arg3[%c0_2, %c0_3] : memref<4x4xf32, #tpu.memory_space<vmem>>, vector<4x4xf32>
    %3 = vector.extract_strided_slice %2 {offsets = [0, 0], sizes = [4, 1], strides = [1, 1]} : vector<4x4xf32> to vector<4x1xf32>
    %4 = vector.extract_strided_slice %1 {offsets = [0, 0], sizes = [1, 256], strides = [1, 1]} : vector<4x256xf32> to vector<1x256xf32>
    %5 = vector.broadcast %3 : vector<4x1xf32> to vector<4x256xf32>
    %6 = vector.broadcast %4 : vector<1x256xf32> to vector<4x256xf32>
    %7 = arith.mulf %5, %6 : vector<4x256xf32>
    %8 = vector.extract_strided_slice %2 {offsets = [0, 1], sizes = [4, 1], strides = [1, 1]} : vector<4x4xf32> to vector<4x1xf32>
    %9 = vector.extract_strided_slice %1 {offsets = [1, 0], sizes = [1, 256], strides = [1, 1]} : vector<4x256xf32> to vector<1x256xf32>
    %10 = vector.broadcast %8 : vector<4x1xf32> to vector<4x256xf32>
    %11 = vector.broadcast %9 : vector<1x256xf32> to vector<4x256xf32>
    %12 = arith.mulf %10, %11 : vector<4x256xf32>
    %13 = arith.addf %7, %12 : vector<4x256xf32>
    %14 = vector.extract_strided_slice %2 {offsets = [0, 2], sizes = [4, 1], strides = [1, 1]} : vector<4x4xf32> to vector<4x1xf32>
    %15 = vector.extract_strided_slice %1 {offsets = [2, 0], sizes = [1, 256], strides = [1, 1]} : vector<4x256xf32> to vector<1x256xf32>
    %16 = vector.broadcast %14 : vector<4x1xf32> to vector<4x256xf32>
    %17 = vector.broadcast %15 : vector<1x256xf32> to vector<4x256xf32>
    %18 = arith.mulf %16, %17 : vector<4x256xf32>
    %19 = arith.addf %13, %18 : vector<4x256xf32>
    %20 = vector.extract_strided_slice %2 {offsets = [0, 3], sizes = [4, 1], strides = [1, 1]} : vector<4x4xf32> to vector<4x1xf32>
    %21 = vector.extract_strided_slice %1 {offsets = [3, 0], sizes = [1, 256], strides = [1, 1]} : vector<4x256xf32> to vector<1x256xf32>
    %22 = vector.broadcast %20 : vector<4x1xf32> to vector<4x256xf32>
    %23 = vector.broadcast %21 : vector<1x256xf32> to vector<4x256xf32>
    %24 = arith.mulf %22, %23 : vector<4x256xf32>
    %25 = arith.addf %19, %24 : vector<4x256xf32>
    %c0_4 = arith.constant 0 : index
    %c0_5 = arith.constant 0 : index
    %26 = vector.load %arg4[%c0_4, %c0_5] : memref<4x1xf32, #tpu.memory_space<vmem>>, vector<4x1xf32>
    %27 = vector.broadcast %26 : vector<4x1xf32> to vector<4x256xf32>
    %28 = arith.addf %25, %27 : vector<4x256xf32>
    %cst = arith.constant 0.000000e+00 : f32
    %29 = vector.broadcast %cst : f32 to vector<4x256xf32>
    %30 = arith.maximumf %28, %29 : vector<4x256xf32>
    %c0_6 = arith.constant 0 : index
    %c0_7 = arith.constant 0 : index
    %31 = vector.load %arg5[%c0_6, %c0_7] : memref<1x4xf32, #tpu.memory_space<vmem>>, vector<1x4xf32>
    %32 = vector.extract_strided_slice %31 {offsets = [0, 0], sizes = [1, 1], strides = [1, 1]} : vector<1x4xf32> to vector<1x1xf32>
    %33 = vector.extract_strided_slice %30 {offsets = [0, 0], sizes = [1, 256], strides = [1, 1]} : vector<4x256xf32> to vector<1x256xf32>
    %34 = vector.broadcast %32 : vector<1x1xf32> to vector<1x256xf32>
    %35 = arith.mulf %34, %33 : vector<1x256xf32>
    %36 = vector.extract_strided_slice %31 {offsets = [0, 1], sizes = [1, 1], strides = [1, 1]} : vector<1x4xf32> to vector<1x1xf32>
    %37 = vector.extract_strided_slice %30 {offsets = [1, 0], sizes = [1, 256], strides = [1, 1]} : vector<4x256xf32> to vector<1x256xf32>
    %38 = vector.broadcast %36 : vector<1x1xf32> to vector<1x256xf32>
    %39 = arith.mulf %38, %37 : vector<1x256xf32>
    %40 = arith.addf %35, %39 : vector<1x256xf32>
    %41 = vector.extract_strided_slice %31 {offsets = [0, 2], sizes = [1, 1], strides = [1, 1]} : vector<1x4xf32> to vector<1x1xf32>
    %42 = vector.extract_strided_slice %30 {offsets = [2, 0], sizes = [1, 256], strides = [1, 1]} : vector<4x256xf32> to vector<1x256xf32>
    %43 = vector.broadcast %41 : vector<1x1xf32> to vector<1x256xf32>
    %44 = arith.mulf %43, %42 : vector<1x256xf32>
    %45 = arith.addf %40, %44 : vector<1x256xf32>
    %46 = vector.extract_strided_slice %31 {offsets = [0, 3], sizes = [1, 1], strides = [1, 1]} : vector<1x4xf32> to vector<1x1xf32>
    %47 = vector.extract_strided_slice %30 {offsets = [3, 0], sizes = [1, 256], strides = [1, 1]} : vector<4x256xf32> to vector<1x256xf32>
    %48 = vector.broadcast %46 : vector<1x1xf32> to vector<1x256xf32>
    %49 = arith.mulf %48, %47 : vector<1x256xf32>
    %50 = arith.addf %45, %49 : vector<1x256xf32>
    %c0_8 = arith.constant 0 : index
    %51 = memref.load %arg6[%c0_8] : memref<1xf32, #tpu.memory_space<smem>>
    %52 = vector.broadcast %51 : f32 to vector<1x256xf32>
    %53 = arith.addf %50, %52 : vector<1x256xf32>
    %54 = arith.negf %53 : vector<1x256xf32>
    %55 = math.exp %54 : vector<1x256xf32>
    %cst_9 = arith.constant 1.000000e+00 : f32
    %56 = vector.broadcast %cst_9 : f32 to vector<1x256xf32>
    %57 = arith.addf %56, %55 : vector<1x256xf32>
    %58 = arith.divf %56, %57 : vector<1x256xf32>
    %c0_10 = arith.constant 0 : index
    %c0_11 = arith.constant 0 : index
    %c0_12 = arith.constant 0 : index
    %59 = vector.load %arg7[%c0_10, %c0_11, %c0_12] : memref<1x1x256xf32, #tpu.memory_space<vmem>>, vector<1x1x256xf32>
    %60 = vector.shape_cast %59 : vector<1x1x256xf32> to vector<1x256xf32>
    %61 = vector.shape_cast %58 : vector<1x256xf32> to vector<1x1x256xf32>
    tpu.vector_store %arg7[%c0_10, %c0_11, %c0_12], %61 {strides = array<i32>} : memref<1x1x256xf32, #tpu.memory_space<vmem>>, vector<1x1x256xf32>,
    return
  }
  func.func @transform_0(%arg0: i32, %arg1: i32) -> (i32, i32, i32) {
    %c0_i32 = arith.constant 0 : i32
    %c0_i32_0 = arith.constant 0 : i32
    return %arg0, %c0_i32, %arg1 : i32, i32, i32
  }
  func.func @transform_1(%arg0: i32, %arg1: i32) -> (i32, i32) {
    %c0_i32 = arith.constant 0 : i32
    %c0_i32_0 = arith.constant 0 : i32
    %c0_i32_1 = arith.constant 0 : i32
    return %c0_i32, %c0_i32_0 : i32, i32
  }
  func.func @transform_2(%arg0: i32, %arg1: i32) -> (i32, i32) {
    %c0_i32 = arith.constant 0 : i32
    %c0_i32_0 = arith.constant 0 : i32
    %c0_i32_1 = arith.constant 0 : i32
    return %c0_i32, %c0_i32_0 : i32, i32
  }
  func.func @transform_3(%arg0: i32, %arg1: i32) -> (i32, i32) {
    %c0_i32 = arith.constant 0 : i32
    %c0_i32_0 = arith.constant 0 : i32
    %c0_i32_1 = arith.constant 0 : i32
    return %c0_i32, %c0_i32_0 : i32, i32
  }
  func.func @transform_4(%arg0: i32, %arg1: i32) -> i32 {
    %c0_i32 = arith.constant 0 : i32
    %c0_i32_0 = arith.constant 0 : i32
    return %c0_i32 : i32
  }
  func.func @transform_5(%arg0: i32, %arg1: i32) -> (i32, i32, i32) {
    %c0_i32 = arith.constant 0 : i32
    %c0_i32_0 = arith.constant 0 : i32
    return %arg0, %c0_i32, %arg1 : i32, i32, i32
  }
}

</mosaic_0001>

<bundles_post_ra>
// kernel: tpu_custom_call.1
= control target key start
LH: loop header
LB: loop body
LE: loop exit
PB: predicated region body
PF: predicated region fallthrough
CT: control target
= control target key end

     0   :  { %s927_s0 = inlined_call_operand.hbm [shape: f32[2,4,256], index: 0, kind: input, shape index: {}]   ;;  %s928_s1 = inlined_call_operand.vmem [shape: f32[4,4], index: 1, kind: input, shape index: {}]   ;;  %s929_s2 = inlined_call_operand.vmem [shape: f32[4,1], index: 2, kind: input, shape index: {}]   ;;  %s930_s3 = inlined_call_operand.vmem [shape: f32[1,4], index: 3, kind: input, shape index: {}]   ;;  %s931_s4 = inlined_call_operand.<no memory space> [shape: f32[1], index: 4, kind: input, shape index: {}]   ;;  %s932_s5 = inlined_call_operand.hbm [shape: f32[2,1,256], index: 5, kind: output, shape index: {}]  }
   0x1   :  { %10 = sst [smem:[#allocation2]] %s931_s4 }
   0x2   :  { %11 = vsyncpa [#allocation4], 0 }
   0x3   :  { %13 = vsyncpa [#allocation4 + $0x1], 0 }
   0x4   :  { %14 = vsyncpa [#allocation5], 0 }
   0x5   :  { %16 = vsyncpa [#allocation5 + $0x1], 0  ;;  %s791_s20 = smov 0   ;;  %s793_s21 = smov 0  }
   0x6   :  { %s795_s22 = smov 0   ;;  %s797_s23 = smov 0  }
   0x7   :  { %s799_s24 = smov 0   ;;  %s801_s25 = smov 0  }
   0x8 LB: > { %s540_s4 = sadd.s32 4294967295, %s752_s25   ;;  %s541_s26 = sadd.s32 4294967294, %s752_s25   ;;  %s752_s25 = sphi %s801_s25, %s22_s25   ;;  %s748_s24 = sphi %s799_s24, %s943_s24   ;;  %s744_s23 = sphi %s797_s23, %s942_s23   ;;  %s740_s22 = sphi %s795_s22, %s941_s22   ;;  %s736_s21 = sphi %s793_s21, %s940_s21   ;;  %s732_s20 = sphi %s791_s20, %s939_s20  }
   0x9   : > { %s34_s27 = sadd.s32 1, %s748_s24  ;;  %s43_s28 = sadd.s32 1, %s740_s22 }
   0xa   : > { %p36_p0 = scmp.ge.s32.totalorder %s34_s27, 2  ;;  %p50_p1 = scmp.ne.s32.totalorder %s740_s22, %s736_s21 }
   0xb   : > { %p51_p2 = scmp.eq.s32.totalorder %s752_s25, 0  ;;  %p56_p3 = scmp.ne.s32.totalorder %s736_s21, %s732_s20 }
   0xc   : > { %s945_s27 = smov (%p36_p0, %s34_s27), 0  ;;  %p57_p5 = scmp.eq.s32.totalorder %s540_s4, 0 }
   0xd   : > { %p832_p4 = por %p51_p2, %p50_p1  ;;  %s38_s30 = ssub.s32 %s748_s24, %s945_s27 }
   0xe   : > { %p166_p6 = scmp.eq.s32.totalorder %s540_s4, 1  ;;  %p41_p7 = scmp.eq.s32.totalorder %s38_s30, 0 }
   0xf   : > { %p838_p8 = por %p57_p5, %p56_p3  ;;  %p172_p10 = scmp.eq.s32.totalorder %s541_s26, 1 }
  0x10   : > { %p842_p9 = por %p166_p6, %p50_p1  ;;  %p543_p12 = scmp.ge.s32.totalorder %s752_s25, 2 }
  0x11   : > { %s847_s8 = scalar_select %p41_p7, %s740_s22, %s43_s28  }
  0x12   : > { %p849_p11 = por %p172_p10, %p56_p3  ;;  %p569_p13 = scmp.lt.s32.totalorder %s752_s25, 2 }
  0x13   : > { %s204_s10 = sand.u32 1, %s740_s22   ;;  %s556_s12 = sshll.u32 %s748_s24, 3 }
  0x14   : > { %s544_s11 = sshll.u32 %s204_s10, 3  ;;  %s215_s15 = scalar_lea.hbm %s927_s0, %s556_s12 }
  0x15   : > { %s208_s16 = scalar_lea.vmem [#allocation3], %s544_s11  ;;  %s217_s18 = sshll.u32 %s215_s15, 4  ;;  %s218_s18 = int_to_ptr.hbm [resolvable:$true] %s217_s18 }
  0x16   : > { %s219_s17 = sshll.u32 %s208_s16, 4  ;;  %p562_p0 = pnand %p569_p13, %p832_p4  ;;  %s220_s17 = int_to_ptr.vmem [resolvable:$true] %s219_s17 }
  0x17   : > { %p547_p1 = scmp.ge.s32.totalorder %s752_s25, 1  ;;  %p224_p2 = scmp.lt.s32.totalorder %s752_s25, 3 }
  0x18   : > { %s205_s19 = scalar_lea.sflag [#allocation4], %s204_s10 }
  0x19   : > { %564 = dma.hbm_to_vmem [thread:$0]  (!%p562_p0), %s218_s18, 128, %s220_s17, %s205_s19  }
  0x1a   : > { %p225_p3 = pnand %p547_p1, %p224_p2 }
  0x1b   : > { %s865_s4 = sand.u32 (!%p225_p3), 1, %s736_s21  }
  0x1c   : > { %228 = sbr.rel (%p225_p3) target bundleno = 219 (0xdb), region = 40  ;;  %s548_s26 = sshll.u32 (!%p225_p3), %s865_s4, 3 }
  0x1d   : > { %s231_s28 = scalar_lea.sflag (!%p225_p3), [#allocation4], %s865_s4  ;;  %s234_s30 = scalar_lea.vmem (!%p225_p3), [#allocation3], %s548_s26 }
  0x21   : > { %723 = dma.done.wait (%p838_p8), %s231_s28, 128  }
  0x22   : > { %725 = vsyncadd (%p838_p8), %s231_s28, 4294967168  ;;  %v754_v0 = vmov 0   ;;  %v755_v1 = vmov 2   ;;  %v265_v2 = vld [vmem:[%s928_s1] sm:$0xf]  ;;  %v756_v4 = vmov 1  }
  0x23   : > { %623 = vset.pattern.permute.xlu0 %v754_v0  ;;  %625 = vset.pattern.permute.xlu1 %v755_v1  ;;  %v322_v3 = vld [vmem:[%s929_s2] sm:$0xf]  ;;  %v757_v5 = vmov 3   ;;  %s386_s14 = sld [smem:[#allocation2]]  ;;  %s549_s15 = sshll.u32 %s865_s4, 1  ;;  %vm431_vm7 = vcmask 1040384  }
  0x24   : > { %627 = vset.pattern.permute.xlu2 %v754_v0  ;;  %268 = vperm.xlu0 %623, %v265_v2   ;;  %v332_v6 = vld [vmem:[%s930_s3] sm:$0x1]  ;;  %s553_s16 = sshll.u32 %s744_s23, 1  ;;  %s261_s23 = scalar_lea.vmem [#allocation6], %s549_s15 }
  0x25   : > { %295 = vperm.xlu1 %625, %v265_v2   ;;  %325 = vperm.xlu2 %627, %v322_v3   ;;  %v264_v8 = vld [vmem:[%s234_s30] sm:$0xff]  ;;  %s452_s19 = scalar_lea.hbm %s932_s5, %s553_s16  ;;  %s454_s26 = sshll.u32 %s261_s23, 4  ;;  %s455_s26 = int_to_ptr.vmem [resolvable:$true] %s454_s26 }
  0x26   : > { %v272_v11 = vperm.slane %v264_v8, 0  ;;  %v273_v12 = vperm.slane %v264_v8, 4  ;;  %v284_v13 = vperm.slane %v264_v8, 1  ;;  %v285_v14 = vperm.slane %v264_v8, 5  ;;  %s456_s28 = sshll.u32 %s452_s19, 4  ;;  %s440_s30 = scalar_lea.sflag [#allocation5], %s865_s4  ;;  %s457_s28 = int_to_ptr.hbm [resolvable:$true] %s456_s28 }
  0x27   : > { %v298_v15 = vperm.slane %v264_v8, 2  ;;  %v299_v16 = vperm.slane %v264_v8, 6  ;;  %v312_v17 = vperm.slane %v264_v8, 3  ;;  %v313_v18 = vperm.slane %v264_v8, 7  ;;  %s684_s29 = sshra.s32 %s457_s28, 4  ;;  %s690_s6 = scalar_lea.hbm %s932_s5, 4  ;;  %s685_s29 = int_to_ptr.hbm [resolvable:$true] %s684_s29 }
  0x28   : > { %v276_v19 = vperm.slane %v272_v11, 0  ;;  %v277_v20 = vperm.slane %v273_v12, 0  ;;  %v288_v21 = vperm.slane %v284_v13, 1  ;;  %v289_v22 = vperm.slane %v285_v14, 1  ;;  %s686_s10 = scalar_lea.hbm %s685_s29, 2  ;;  %p691_p7 = scmp.lt.s32.totalorder %s685_s29, %s932_s5 }
  0x29   : > { %v302_v24 = vperm.slane %v298_v15, 2  ;;  %v303_v25 = vperm.slane %v299_v16, 2  ;;  %v316_v26 = vperm.slane %v312_v17, 3  ;;  %v317_v27 = vperm.slane %v313_v18, 3  ;;  %p687_p4 = scmp.ne.s32.totalorder %s685_s29, %s686_s10  ;;  %p692_p8 = scmp.lt.s32.totalorder %s690_s6, %s686_s10 }
  0x2b   : > { %p688_p5 = pnand %p687_p4, %p842_p9  ;;  %p693_p10 = por %p692_p8, %p691_p7 }
  0x2c   : > { %624 = vset.pattern.permute.xlu0 %v756_v4 }
  0x2d   : > { %626 = vset.pattern.permute.xlu1 %v757_v5  ;;  %281 = vperm.xlu0 %624, %v265_v2   ;;  %p689_p6 = pneg %p688_p5 }
  0x2e   : > { %309 = vperm.xlu1 %626, %v265_v2   ;;  %628 = vset.pattern.permute.xlu2 %v756_v4 }
  0x2f   : > { %342 = vperm.xlu2 %628, %v332_v6   ;;  %p694_p13 = pnand %p693_p10, %p689_p6 }
  0x35   : > { %631 = vset.pattern.permute.xlu0 %v757_v5 }
  0x36   : > { %629 = vset.pattern.permute.xlu1 %v754_v0  ;;  %372 = vperm.xlu0 %631, %v332_v6  }
  0x37   : > { %335 = vperm.xlu1 %629, %v332_v6   ;;  %630 = vset.pattern.permute.xlu2 %v755_v1 }
  0x38   : > { %357 = vperm.xlu2 %630, %v332_v6  }
  0x7f   : > { %v326_v7 = vpop.permute.xlu2 %325 }
  0x89   : > { %v343_v23 = vpop.permute.xlu2 %342 }
  0x8a   : > { %v345_v53 = vperm.slane %v343_v23, 0 }
  0x92   : > { %v358_v44 = vpop.permute.xlu2 %357 }
  0x93   : > { %v360_v49 = vperm.slane %v358_v44, 0 }
  0x96   : > { %v269_v9 = vpop.permute.xlu0 %268 }
  0x97   : > { %v296_v10 = vpop.permute.xlu1 %295  ;;  %v278_v30 = vmul.f32 %v276_v19, %v269_v9  ;;  %v279_v31 = vmul.f32 %v277_v20, %v269_v9  ;;  %v387_v9 = vstv %s386_s14 }
  0x98   : > { %v304_v34 = vmul.f32 %v302_v24, %v296_v10  ;;  %v305_v35 = vmul.f32 %v303_v25, %v296_v10 }
  0x9f   : > { %v282_v28 = vpop.permute.xlu0 %281 }
  0xa0   : > { %v310_v29 = vpop.permute.xlu1 %309  ;;  %v290_v32 = vmul.f32 %v288_v21, %v282_v28  ;;  %v291_v33 = vmul.f32 %v289_v22, %v282_v28 }
  0xa1   : > { %v318_v38 = vmul.f32 %v316_v26, %v310_v29  ;;  %v319_v39 = vmul.f32 %v317_v27, %v310_v29 }
  0xa2   : > { %v292_v36 = vadd.f32 %v290_v32, %v278_v30  ;;  %v293_v37 = vadd.f32 %v291_v33, %v279_v31 }
  0xa4   : > { %v306_v40 = vadd.f32 %v304_v34, %v292_v36  ;;  %v307_v41 = vadd.f32 %v305_v35, %v293_v37  ;;  %v434_v35 = vlaneseq }
  0xa6   : > { %v320_v42 = vadd.f32 %v318_v38, %v306_v40  ;;  %v321_v43 = vadd.f32 %v319_v39, %v307_v41  ;;  %vm436_vm9 = vcmp.lt.s32.totalorder %v434_v35, 256 }
  0xa8   : > { %v328_v45 = vadd.f32 %v326_v7, %v320_v42  ;;  %v329_v46 = vadd.f32 %v326_v7, %v321_v43  ;;  %v373_v48 = vpop.permute.xlu0 %372 }
  0xa9   : > { %v336_v47 = vpop.permute.xlu1 %335  ;;  %v375_v54 = vperm.slane %v373_v48, 0 }
  0xaa   : > { %v330_v50 = vmax.f32 %v328_v45, 0.0  ;;  %v331_v51 = vmax.f32 %v329_v46, 0.0  ;;  %v338_v52 = vperm.slane %v336_v47, 0 }
  0xac   : > { %v361_v55 = vmul.f32 %v360_v49, %v330_v50  ;;  %v362_v56 = vmul.f32 %v360_v49, %v331_v51  ;;  %v346_v57 = vmul.f32 %v345_v53, %v330_v50  ;;  %v347_v58 = vmul.f32 %v345_v53, %v331_v51 }
  0xad   : > { %v339_v59 = vmul.f32 %v338_v52, %v330_v50  ;;  %v340_v60 = vmul.f32 %v338_v52, %v331_v51  ;;  %v376_v63 = vmul.f32 %v375_v54, %v330_v50  ;;  %v377_v0 = vmul.f32 %v375_v54, %v331_v51 }
  0xae   : > { %v350_v61 = vrot.slane %v346_v57, 1  ;;  %v351_v62 = vrot.slane %v347_v58, 1  ;;  %v365_v1 = vrot.slane %v361_v55, 2  ;;  %v366_v2 = vrot.slane %v362_v56, 2 }
  0xaf   : > { %v380_v7 = vrot.slane %v376_v63, 3  ;;  %v381_v8 = vrot.slane %v377_v0, 3 }
  0xb0   : > { %v354_v3 = vadd.f32 %v350_v61, %v339_v59  ;;  %v355_v4 = vadd.f32 %v351_v62, %v340_v60 }
  0xb2   : > { %v369_v5 = vadd.f32 %v365_v1, %v354_v3  ;;  %v370_v6 = vadd.f32 %v366_v2, %v355_v4 }
  0xb4   : > { %v384_v10 = vadd.f32 %v380_v7, %v369_v5  ;;  %v385_v11 = vadd.f32 %v381_v8, %v370_v6 }
  0xb6   : > { %v388_v12 = vadd.f32 %v387_v9, %v384_v10  ;;  %v389_v13 = vadd.f32 %v387_v9, %v385_v11 }
  0xb8   : > { %v550_v14 = vmul.f32 -1.442695, %v388_v12  ;;  %v551_v15 = vmul.f32 -1.442695, %v389_v13 }
  0xba   : > { %632 = vpow2.f32 %v550_v14 }
  0xbb   : > { %634 = vpow2.f32 %v551_v15 }
  0xc0   : > { %v633_v16 = vpop.eup %632 }
  0xc1   : > { %v635_v17 = vpop.eup %634  ;;  %v396_v18 = vadd.f32 1.0, %v633_v16 }
  0xc2   : > { %v397_v19 = vadd.f32 1.0, %v635_v17 }
  0xc3   : > { %636 = vrcp.f32 %v396_v18  ;;  %vm403_vm2 = vweird.f32 %v396_v18  ;;  %v409_v31 = vand.u32 2147483648, %v396_v18  ;;  %v407_v33 = vand.u32 2147483647, %v396_v18 }
  0xc4   : > { %638 = vrcp.f32 %v397_v19  ;;  %v424_v27 = vand.u32 2147483648, %v397_v19  ;;  %v422_v29 = vand.u32 2147483647, %v397_v19  ;;  %vm418_vm4 = vweird.f32 %v397_v19 }
  0xc5   : > { %v410_v39 = vor.u32 1.1754944e-38, %v409_v31  ;;  %vm408_vm8 = vcmp.eq.f32.partialorder %v407_v33, 8.507059e+37 }
  0xc6   : > { %v425_v36 = vor.u32 1.1754944e-38, %v424_v27  ;;  %vm423_vm6 = vcmp.eq.f32.partialorder %v422_v29, 8.507059e+37 }
  0xc9   : > { %v637_v20 = vpop.eup %636 }
  0xca   : > { %v639_v21 = vpop.eup %638  ;;  %v399_v22 = vmul.f32 %v637_v20, %v396_v18  ;;  %vm404_vm0 = vweird.f32 %v637_v20 }
  0xcb   : > { %v414_v23 = vmul.f32 %v639_v21, %v397_v19  ;;  %vm419_vm1 = vweird.f32 %v639_v21  ;;  %vm887_vm3 = vmor %vm403_vm2, %vm404_vm0 }
  0xcc   : > { %v400_v24 = vsub.f32 1.0, %v399_v22  ;;  %vm420_vm5 = vmor %vm418_vm4, %vm419_vm1 }
  0xcd   : > { %v415_v25 = vsub.f32 1.0, %v414_v23 }
  0xce   : > { %v401_v26 = vmul.f32 %v637_v20, %v400_v24 }
  0xcf   : > { %v416_v28 = vmul.f32 %v639_v21, %v415_v25 }
  0xd0   : > { %v402_v30 = vadd.f32 %v637_v20, %v401_v26 }
  0xd1   : > { %v417_v34 = vadd.f32 %v639_v21, %v416_v28 }
  0xd2   : > { %v406_v37 = vsel %vm887_vm3, %v637_v20, %v402_v30 }
  0xd3   : > { %v421_v38 = vsel %vm420_vm5, %v639_v21, %v417_v34  ;;  %v411_v42 = vsel %vm408_vm8, %v410_v39, %v406_v37 }
  0xd4   : > { %v426_v40 = vsel %vm423_vm6, %v425_v36, %v421_v38 }
  0xd5   : > { %v430_v41 = vrot.slane %v426_v40, 7 }
  0xd7   : > { %v432_v43 = vsel %vm431_vm7, %v411_v42, %v430_v41 }
  0xd8   : > { %438 = vst.msk [vmem:[%s261_s23] sm:$0x3] %vm436_vm9, %v432_v43 }
  0xd9   : > { %697 = shalt.err (!%p694_p13)
}
  0xda   : > { %559 = dma.vmem_to_hbm [thread:$0]  (%p842_p9), %s455_s26, 32, %s457_s28, %s440_s30  }
  0xdb PF: > { %s468_s4 = sand.u32 1, %s732_s20   ;;  %p566_p0 = pnand %p543_p12, %p849_p11 }
  0xdc   : > { %s469_s15 = scalar_lea.sflag [#allocation5], %s468_s4 }
  0xdd   : > { %p567_p1 = pneg %p566_p0 }
  0xdf   : > { %727 = dma.done.wait (%p567_p1), %s469_s15, 32  }
  0xe0   : > { %729 = vsyncadd (%p567_p1), %s469_s15, 4294967264  ;;  %s22_s25 = sadd.s32 1, %s752_s25   ;;  %s939_s20 = smov %s736_s21 }
  0xe1   : > { %p19_p2 = scmp.ge.s32.totalorder %s22_s25, 4   ;;  %s940_s21 = smov %s740_s22 }
  0xe2   : > { %s941_s22 = smov %s847_s8  ;;  %s942_s23 = smov %s748_s24 }
  0xe3   : > { %s943_s24 = smov %s945_s27  ;;  %21 = sbr.rel (!%p19_p2) target bundleno = 8 (0x8), region = 85 }
  0xe8   :  { %475 = vsyncpa [#allocation4], 1 }
  0xe9   :  { %477 = vsyncpa [#allocation4 + $0x1], 1 }
  0xea   :  { %478 = vsyncpa [#allocation5], 1 }
  0xeb   :  { %480 = vsyncpa [#allocation5 + $0x1], 1 }

</bundles_post_ra>
